<compile_context>
chip_gen: v7x
topology: tpu7x:2x2x1
jax: 0.10.0
libtpu: 0.0.40
codegen_flags: <defaults>
</compile_context>

<pallas_src>
import functools

import jax
import jax.numpy as jnp
import numpy as np
from jax import lax
from jax.experimental import pallas as pl
from jax.experimental.pallas import tpu as pltpu


# ----------------------------------------------------------------------------------
# Kernel 1: accumulate the two Grams per half, tiled over (padded) samples.
# ----------------------------------------------------------------------------------
def _moments_kernel(psi_ref, g_ref, cov_ref, dcov_ref):
    # psi_ref: (R, tile_n)       f32, sqrt(w * norm)-weighted model outputs
    # g_ref:   (R, tile_n * D)   bf16, sqrt(w * norm) * (friction/cell)-weighted Jacobian,
    #                            lanes ordered sample-major / feature-minor
    # cov_ref, dcov_ref: (R, R)  output blocks resident across the tile axis (accumulators)
    t = pl.program_id(1)

    @pl.when(t == 0)
    def _init():
        cov_ref[...] = jnp.zeros_like(cov_ref)
        dcov_ref[...] = jnp.zeros_like(dcov_ref)

    psi = psi_ref[...]
    g = g_ref[...]

    # cov  += psi @ psi^T  (contract the tile_n lane axis)
    cov_ref[...] += lax.dot_general(
        psi, psi, (((1,), (1,)), ((), ())), preferred_element_type=jnp.float32)

    # dcov += G @ G^T with G the (R, tile_n*D) flattened per-sample Jacobian: one big MXU
    # contraction over the joint (sample, feature) axis instead of D tiny per-k Grams.
    dcov_ref[...] += lax.dot_general(
        g, g, (((1,), (1,)), ((), ())), preferred_element_type=jnp.float32)


# ----------------------------------------------------------------------------------
# Kernel 2: combine the (already normalized) covariances into the three loss scalars.
# ----------------------------------------------------------------------------------
def _finalize_kernel(cov_ref, dcov_ref, lam2_ref, l2o_ref, out_ref, *, eta, gamma):
    # cov_ref/dcov_ref: (2, R, R) fully-normalized covariances (X = index 0, Y = index 1)
    # lam2_ref: (1, R) = lambdas**2 ;  l2o_ref: (R, R) = outer(lambdas**2, lambdas**2)
    lam2 = lam2_ref[...]
    l2o = l2o_ref[...]
    cov_X = cov_ref[0]
    cov_Y = cov_ref[1]
    A_X = eta * cov_X + dcov_ref[0]
    A_Y = eta * cov_Y + dcov_ref[1]

    r = cov_X.shape[0]
    row = lax.broadcasted_iota(jnp.int32, (r, r), 0)
    col = lax.broadcasted_iota(jnp.int32, (r, r), 1)
    eye = (row == col).astype(jnp.float32)

    # tr(cov_X @ dl @ (eta cov_Y + dcov_Y) @ dl) == sum(cov_X * A_Y * lam2_outer)
    # (the A_* Grams are symmetric), so no RxR matmuls / transposes are needed.
    tr_xy = jnp.sum(cov_X * A_Y * l2o)
    tr_yx = jnp.sum(cov_Y * A_X * l2o)
    tr_x = jnp.sum(cov_X * eye * lam2)              # tr(cov_X @ dl)
    tr_y = jnp.sum(cov_Y * eye * lam2)              # tr(cov_Y @ dl)
    loss_ef = 0.5 * (tr_xy + tr_yx) - tr_x - tr_y

    diff = eye - cov_X
    loss_ortho = gamma * jnp.sum(diff * diff)       # gamma * ||I - cov_X||_F^2
    loss = loss_ef + loss_ortho

    # Pack the three scalars into one full-lane-width row (unmasked store).
    lane = lax.broadcasted_iota(jnp.int32, out_ref.shape, 1)
    out_ref[...] = (jnp.where(lane == 0, loss, 0.0)
                    + jnp.where(lane == 1, loss_ef, 0.0)
                    + jnp.where(lane == 2, loss_ortho, 0.0))


# ----------------------------------------------------------------------------------
# Wrapper helpers
# ----------------------------------------------------------------------------------
def _vmem_capacity_bytes():
    try:
        return int(pltpu.get_tpu_info().vmem_capacity_bytes)
    except Exception:
        return 64 * 1024 * 1024          # conservative default (v7x per-core VMEM)


def _pick_tile_n(half_p, R, D, vmem_cap):
    """Largest 128-multiple dividing half_p whose double-buffered blocks fit ~1/4 VMEM."""
    budget = vmem_cap // 4
    cands = [t for t in range(128, min(half_p, 4096) + 1, 128) if half_p % t == 0]
    for cand in sorted(cands, reverse=True):
        need = 2 * (R * cand * D * 2 + R * cand * 4)   # bf16 g + f32 psi, double-buffered
        if need <= budget:
            return cand
    return 128


# ----------------------------------------------------------------------------------
# Wrapper
# ----------------------------------------------------------------------------------
def generator_loss(data, output, weights, lambdas, *, eta, friction, gamma, cell,
                   model_fn):
    N, R = output.shape
    D = data.shape[1]
    assert N % 2 == 0, "GeneratorLoss expects an even batch (X/Y halves)"
    half = N // 2

    # TODO(synk): torch.autograd.grad through the model has no Pallas equivalent; the
    # per-sample Jacobian is computed with jax.vmap(jax.jacrev(...)) as glue.  out_axes=1
    # emits it directly in (R, N, D) order so no D-major relayout of the dominant tensor
    # is needed before the kernel.
    jac = jax.vmap(jax.jacrev(model_fn), in_axes=0, out_axes=1)(data)
    jac = jac.astype(jnp.float32)                                    # (R, N, D)

    # Fold all per-sample scalings into the streams in f32 (weight once, before the bf16
    # cast): the raw weight, the per-half normalization n/((n-1)*sum(w)) and (for the
    # gradient) the friction/cell scale.  NOTE: the sqrt-folding assumes weights >= 0
    # (always true for reweighting factors); that makes each weighted Gram a plain
    # A_w @ A_w^T so only one copy of the dominant tensor is streamed.
    w = weights.astype(jnp.float32)
    sum_w = w.reshape(2, half).sum(axis=1)                           # (2,)
    norm = half / ((half - 1.0) * sum_w)                             # (2,)
    sw = jnp.sqrt(w * jnp.repeat(norm, half))                        # (N,)

    psi_w = (output.astype(jnp.float32) * sw[:, None]).T             # (R, N) f32
    g_w = (jac * (sw * (float(friction) / float(cell)))[None, :, None]
           ).astype(jnp.bfloat16)                                    # (R, N, D) bf16

    # Zero-pad each half's sample axis to a 128-multiple (exact: padded columns are 0).
    half_p = ((half + 127) // 128) * 128
    if half_p != half:
        pad = half_p - half
        psi_w = jnp.pad(psi_w.reshape(R, 2, half), ((0, 0), (0, 0), (0, pad)))
        g_w = jnp.pad(g_w.reshape(R, 2, half, D), ((0, 0), (0, 0), (0, pad), (0, 0)))
    psi_w = psi_w.reshape(R, 2 * half_p)                             # (R, 2*half_p)
    g_w = g_w.reshape(R, 2 * half_p * D)                             # (R, 2*half_p*D)

    vmem_cap = _vmem_capacity_bytes()
    tile_n = _pick_tile_n(half_p, R, D, vmem_cap)
    num_tiles = half_p // tile_n

    n_p = 2 * half_p
    flops = 2 * n_p * D * R * R + 2 * n_p * R * R
    bytes_accessed = n_p * D * R * 2 + n_p * R * 4 + 4 * 4 * R * R

    cov, dcov = pl.pallas_call(
        _moments_kernel,
        grid=(2, num_tiles),
        in_specs=[
            pl.BlockSpec((R, tile_n), lambda h, t: (0, h * num_tiles + t)),
            pl.BlockSpec((R, tile_n * D), lambda h, t: (0, h * num_tiles + t)),
        ],
        out_specs=(
            pl.BlockSpec((None, R, R), lambda h, t: (h, 0, 0)),
            pl.BlockSpec((None, R, R), lambda h, t: (h, 0, 0)),
        ),
        out_shape=(
            jax.ShapeDtypeStruct((2, R, R), jnp.float32),
            jax.ShapeDtypeStruct((2, R, R), jnp.float32),
        ),
        compiler_params=pltpu.CompilerParams(
            dimension_semantics=("parallel", "arbitrary"),
            vmem_limit_bytes=int(vmem_cap * 3 // 4)),
        cost_estimate=pl.CostEstimate(flops=flops, transcendentals=0,
                                      bytes_accessed=bytes_accessed),
    )(psi_w, g_w)

    lam2 = lambdas.astype(jnp.float32) ** 2
    lam2_row = lam2.reshape(1, R)
    lam2_outer = lam2[:, None] * lam2[None, :]

    packed = pl.pallas_call(
        functools.partial(_finalize_kernel, eta=float(eta), gamma=float(gamma)),
        grid=(1,),
        in_specs=[
            pl.BlockSpec((2, R, R), lambda i: (0, 0, 0)),
            pl.BlockSpec((2, R, R), lambda i: (0, 0, 0)),
            pl.BlockSpec((1, R), lambda i: (0, 0)),
            pl.BlockSpec((R, R), lambda i: (0, 0)),
        ],
        out_specs=pl.BlockSpec((1, 128), lambda i: (0, 0)),
        out_shape=jax.ShapeDtypeStruct((1, 128), jnp.float32),
    )(cov, dcov, lam2_row, lam2_outer)

    return packed[0, 0], packed[0, 1], packed[0, 2]


# ----------------------------------------------------------------------------------
# Pure-JAX reference mirroring the PyTorch forward.
# ----------------------------------------------------------------------------------
def reference_loss(data, output, weights, lambdas, *, eta, friction, gamma, cell,
                   model_fn):
    N, R = output.shape
    half = N // 2
    jac = jax.vmap(jax.jacrev(model_fn))(data)                 # (N, R, D)
    gradient = (jac * friction).reshape(N, R, -1) / cell
    hp = lax.Precision.HIGHEST

    def cov2(X, wv):
        n = X.shape[0]
        return (n / (n - 1)) * jnp.einsum('ij,ik,i->jk', X, X, wv / wv.mean(),
                                          precision=hp) / n

    def cov3(G, wv):
        n = G.shape[0]
        return (n / (n - 1)) * jnp.einsum('ijk,ilk,i->jl', G, G, wv / wv.mean(),
                                          precision=hp) / n

    wX, wY = weights[:half], weights[half:]
    psiX, psiY = output[:half], output[half:]
    gX, gY = gradient[:half], gradient[half:]
    lam = lambdas ** 2
    dl = jnp.diag(lam)
    cov_X, cov_Y = cov2(psiX, wX), cov2(psiY, wY)
    dcov_X, dcov_Y = cov3(gX, wX), cov3(gY, wY)
    W1 = (eta * cov_X + dcov_X) @ dl
    W2 = (eta * cov_Y + dcov_Y) @ dl
    loss_ef = jnp.trace((cov_X @ dl @ W2 + cov_Y @ dl @ W1) / 2
                        - cov_X @ dl - cov_Y @ dl)
    I = jnp.eye(R, dtype=jnp.float32)
    loss_ortho = gamma * jnp.trace((I - cov_X).T @ (I - cov_X))
    return loss_ef + loss_ortho, loss_ef, loss_ortho


if __name__ == "__main__":
    key = jax.random.PRNGKey(0)
    k_data, k_w, k_lam, k_w1, k_w2, k_b1, k_b2 = jax.random.split(key, 7)

    N, D, H, R = 16, 32, 16, 4          # batch, data dim, hidden, n_cvs
    eta, friction, gamma, cell = 0.5, 0.1, 0.01, 2.0

    data = jax.random.normal(k_data, (N, D), jnp.float32)
    weights = jax.random.uniform(k_w, (N,), jnp.float32, 0.5, 1.5)
    # module parameter: lambdas = 10 * randn(n_cvs), initialized deterministically
    lambdas = 10.0 * jax.random.normal(k_lam, (R,), jnp.float32)

    # deterministic synthetic "model" (stands in for self.model): MLP (D -> H -> R)
    W1m = 0.1 * jax.random.normal(k_w1, (D, H), jnp.float32)
    b1m = 0.01 * jax.random.normal(k_b1, (H,), jnp.float32)
    W2m = 0.1 * jax.random.normal(k_w2, (H, R), jnp.float32)
    b2m = 0.01 * jax.random.normal(k_b2, (R,), jnp.float32)

    def model_fn(x):                     # x: (D,) -> (R,)
        return jnp.tanh(x @ W1m + b1m) @ W2m + b2m

    output = jax.vmap(model_fn)(data)    # (N, R)

    loss, loss_ef, loss_ortho = generator_loss(
        data, output, weights, lambdas,
        eta=eta, friction=friction, gamma=gamma, cell=cell, model_fn=model_fn)
    jax.block_until_ready(loss)

    ref_loss, ref_ef, ref_ortho = reference_loss(
        data, output, weights, lambdas,
        eta=eta, friction=friction, gamma=gamma, cell=cell, model_fn=model_fn)

    # Tolerances account for bf16 streaming of the gradient Gram and default MXU
    # precision on the f32 psi Gram (the reference runs at Precision.HIGHEST).
    np.testing.assert_allclose(np.array(loss), np.array(ref_loss), rtol=2e-2, atol=2e-2)
    np.testing.assert_allclose(np.array(loss_ef), np.array(ref_ef), rtol=2e-2, atol=2e-2)
    np.testing.assert_allclose(np.array(loss_ortho), np.array(ref_ortho),
                               rtol=2e-2, atol=2e-2)

    print("KERNEL_OK")
</pallas_src>

<mosaic_0001>
module attributes {stable_mosaic.version = 11 : i64} {
  func.func @_moments_kernel(%arg0: i32, %arg1: i32, %arg2: memref<4x128xf32, #tpu.memory_space<vmem>>, %arg3: memref<4x4096xbf16, #tpu.memory_space<vmem>>, %arg4: memref<1x4x4xf32, #tpu.memory_space<vmem>>, %arg5: memref<1x4x4xf32, #tpu.memory_space<vmem>>) attributes {dimension_semantics = [#tpu.dimension_semantics<parallel>, #tpu.dimension_semantics<arbitrary>], iteration_bounds = array<i64: 2, 1>, scalar_prefetch = 0 : i64, scratch_operands = 0 : i64, tpu.core_type = #tpu.core_type<tc>, window_params = [{transform_indices = @transform_0, window_bounds = array<i64: 4, 128>}, {transform_indices = @transform_1, window_bounds = array<i64: 4, 4096>}, {transform_indices = @transform_2, window_bounds = array<i64: 1, 4, 4>}, {transform_indices = @transform_3, window_bounds = array<i64: 1, 4, 4>}]} {
    %c0_i32 = arith.constant 0 : i32
    %0 = arith.cmpi eq, %arg1, %c0_i32 : i32
    %1 = arith.extui %0 : i1 to i32
    %c0_i32_0 = arith.constant 0 : i32
    %2 = arith.cmpi ne, %1, %c0_i32_0 : i32
    scf.if %2 {
      %cst_17 = arith.constant 0.000000e+00 : f32
      %19 = vector.broadcast %cst_17 : f32 to vector<4x4xf32>
      %c0_18 = arith.constant 0 : index
      %c0_19 = arith.constant 0 : index
      %c0_20 = arith.constant 0 : index
      %20 = vector.load %arg4[%c0_18, %c0_19, %c0_20] : memref<1x4x4xf32, #tpu.memory_space<vmem>>, vector<1x4x4xf32>
      %21 = vector.shape_cast %20 : vector<1x4x4xf32> to vector<4x4xf32>
      %22 = vector.shape_cast %19 : vector<4x4xf32> to vector<1x4x4xf32>
      tpu.vector_store %arg4[%c0_18, %c0_19, %c0_20], %22 {strides = array<i32>} : memref<1x4x4xf32, #tpu.memory_space<vmem>>, vector<1x4x4xf32>,
      %cst_21 = arith.constant 0.000000e+00 : f32
      %23 = vector.broadcast %cst_21 : f32 to vector<4x4xf32>
      %c0_22 = arith.constant 0 : index
      %c0_23 = arith.constant 0 : index
      %c0_24 = arith.constant 0 : index
      %24 = vector.load %arg5[%c0_22, %c0_23, %c0_24] : memref<1x4x4xf32, #tpu.memory_space<vmem>>, vector<1x4x4xf32>
      %25 = vector.shape_cast %24 : vector<1x4x4xf32> to vector<4x4xf32>
      %26 = vector.shape_cast %23 : vector<4x4xf32> to vector<1x4x4xf32>
      tpu.vector_store %arg5[%c0_22, %c0_23, %c0_24], %26 {strides = array<i32>} : memref<1x4x4xf32, #tpu.memory_space<vmem>>, vector<1x4x4xf32>,
    } else {
    }
    %c0 = arith.constant 0 : index
    %c0_1 = arith.constant 0 : index
    %3 = vector.load %arg2[%c0, %c0_1] : memref<4x128xf32, #tpu.memory_space<vmem>>, vector<4x128xf32>
    %c0_2 = arith.constant 0 : index
    %c0_3 = arith.constant 0 : index
    %4 = vector.load %arg3[%c0_2, %c0_3] : memref<4x4096xbf16, #tpu.memory_space<vmem>>, vector<4x4096xbf16>
    %c0_4 = arith.constant 0 : index
    %c0_5 = arith.constant 0 : index
    %c0_6 = arith.constant 0 : index
    %5 = vector.load %arg4[%c0_4, %c0_5, %c0_6] : memref<1x4x4xf32, #tpu.memory_space<vmem>>, vector<1x4x4xf32>
    %6 = vector.shape_cast %5 : vector<1x4x4xf32> to vector<4x4xf32>
    %cst = arith.constant dense<0.000000e+00> : vector<4x4xf32>
    %7 = tpu.matmul %3, %3, %cst {dimension_numbers = #tpu.dot_dimension_numbers<[1], [1], [0], [0], [0, 0, 1, 0], [], []>} : vector<4x128xf32>, vector<4x128xf32>, vector<4x4xf32> -> vector<4x4xf32>
    %8 = arith.addf %6, %7 : vector<4x4xf32>
    %c0_7 = arith.constant 0 : index
    %c0_8 = arith.constant 0 : index
    %c0_9 = arith.constant 0 : index
    %9 = vector.load %arg4[%c0_7, %c0_8, %c0_9] : memref<1x4x4xf32, #tpu.memory_space<vmem>>, vector<1x4x4xf32>
    %10 = vector.shape_cast %9 : vector<1x4x4xf32> to vector<4x4xf32>
    %11 = vector.shape_cast %8 : vector<4x4xf32> to vector<1x4x4xf32>
    tpu.vector_store %arg4[%c0_7, %c0_8, %c0_9], %11 {strides = array<i32>} : memref<1x4x4xf32, #tpu.memory_space<vmem>>, vector<1x4x4xf32>,
    %c0_10 = arith.constant 0 : index
    %c0_11 = arith.constant 0 : index
    %c0_12 = arith.constant 0 : index
    %12 = vector.load %arg5[%c0_10, %c0_11, %c0_12] : memref<1x4x4xf32, #tpu.memory_space<vmem>>, vector<1x4x4xf32>
    %13 = vector.shape_cast %12 : vector<1x4x4xf32> to vector<4x4xf32>
    %cst_13 = arith.constant dense<0.000000e+00> : vector<4x4xf32>
    %14 = tpu.matmul %4, %4, %cst_13 {dimension_numbers = #tpu.dot_dimension_numbers<[1], [1], [0], [0], [0, 0, 1, 0], [], []>} : vector<4x4096xbf16>, vector<4x4096xbf16>, vector<4x4xf32> -> vector<4x4xf32>
    %15 = arith.addf %13, %14 : vector<4x4xf32>
    %c0_14 = arith.constant 0 : index
    %c0_15 = arith.constant 0 : index
    %c0_16 = arith.constant 0 : index
    %16 = vector.load %arg5[%c0_14, %c0_15, %c0_16] : memref<1x4x4xf32, #tpu.memory_space<vmem>>, vector<1x4x4xf32>
    %17 = vector.shape_cast %16 : vector<1x4x4xf32> to vector<4x4xf32>
    %18 = vector.shape_cast %15 : vector<4x4xf32> to vector<1x4x4xf32>
    tpu.vector_store %arg5[%c0_14, %c0_15, %c0_16], %18 {strides = array<i32>} : memref<1x4x4xf32, #tpu.memory_space<vmem>>, vector<1x4x4xf32>,
    return
  }
  func.func @transform_0(%arg0: i32, %arg1: i32) -> (i32, i32) {
    %c1_i32 = arith.constant 1 : i32
    %0 = arith.muli %arg0, %c1_i32 : i32
    %1 = arith.addi %0, %arg1 : i32
    %c0_i32 = arith.constant 0 : i32
    %c0_i32_0 = arith.constant 0 : i32
    return %c0_i32, %1 : i32, i32
  }
  func.func @transform_1(%arg0: i32, %arg1: i32) -> (i32, i32) {
    %c1_i32 = arith.constant 1 : i32
    %0 = arith.muli %arg0, %c1_i32 : i32
    %1 = arith.addi %0, %arg1 : i32
    %c0_i32 = arith.constant 0 : i32
    %c0_i32_0 = arith.constant 0 : i32
    return %c0_i32, %1 : i32, i32
  }
  func.func @transform_2(%arg0: i32, %arg1: i32) -> (i32, i32, i32) {
    %c0_i32 = arith.constant 0 : i32
    %c0_i32_0 = arith.constant 0 : i32
    %c0_i32_1 = arith.constant 0 : i32
    return %arg0, %c0_i32, %c0_i32_0 : i32, i32, i32
  }
  func.func @transform_3(%arg0: i32, %arg1: i32) -> (i32, i32, i32) {
    %c0_i32 = arith.constant 0 : i32
    %c0_i32_0 = arith.constant 0 : i32
    %c0_i32_1 = arith.constant 0 : i32
    return %arg0, %c0_i32, %c0_i32_0 : i32, i32, i32
  }
}

</mosaic_0001>

<bundles_post_ra>
// kernel: tpu_custom_call.1
= control target key start
LH: loop header
LB: loop body
LE: loop exit
PB: predicated region body
PF: predicated region fallthrough
CT: control target
= control target key end

     0   :  { %9 = vsyncpa [#allocation3], 0  ;;  %s1943_s0 = inlined_call_operand.hbm [shape: f32[4,256], index: 0, kind: input, shape index: {}]   ;;  %s1944_s1 = inlined_call_operand.hbm [shape: bf16[4,8192], index: 1, kind: input, shape index: {}]   ;;  %s1945_s2 = inlined_call_operand.hbm [shape: f32[2,4,4], index: 2, kind: output, shape index: {0}]   ;;  %s1946_s3 = inlined_call_operand.hbm [shape: f32[2,4,4], index: 3, kind: output, shape index: {1}]  }
   0x1   :  { %11 = vsyncpa [#allocation3 + $0x1], 0 }
   0x2   :  { %12 = vsyncpa [#allocation6], 0 }
   0x3   :  { %14 = vsyncpa [#allocation6 + $0x1], 0 }
   0x4   :  { %15 = vsyncpa [#allocation4], 0 }
   0x5   :  { %17 = vsyncpa [#allocation4 + $0x1], 0 }
   0x6   :  { %18 = vsyncpa [#allocation9], 0 }
   0x7   :  { %20 = vsyncpa [#allocation9 + $0x1], 0  ;;  %s1651_s12 = smov 0   ;;  %s1653_s13 = smov 0  }
   0x8   :  { %s1655_s14 = smov 0   ;;  %s1657_s15 = smov 0  }
   0x9   :  { %s1659_s16 = smov 0   ;;  %s1661_s17 = smov 0  }
   0xa LB: > { %s1333_s18 = sadd.s32 4294967295, %s1622_s17   ;;  %s1334_s19 = sadd.s32 4294967294, %s1622_s17   ;;  %s1622_s17 = sphi %s1661_s17, %s26_s17   ;;  %s1618_s16 = sphi %s1659_s16, %s1966_s16   ;;  %s1614_s15 = sphi %s1657_s15, %s1965_s15   ;;  %s1610_s14 = sphi %s1655_s14, %s1964_s14   ;;  %s1606_s13 = sphi %s1653_s13, %s1963_s13   ;;  %s1602_s12 = sphi %s1651_s12, %s1962_s12  }
   0xb   : > { %s38_s20 = sadd.s32 1, %s1618_s16  ;;  %s47_s21 = sadd.s32 1, %s1610_s14 }
   0xc   : > { %p40_p0 = scmp.ge.s32.totalorder %s38_s20, 2  ;;  %p54_p1 = scmp.ne.s32.totalorder %s1610_s14, %s1606_s13 }
   0xd   : > { %p55_p2 = scmp.eq.s32.totalorder %s1622_s17, 0  ;;  %p60_p3 = scmp.ne.s32.totalorder %s1606_s13, %s1602_s12 }
   0xe   : > { %s1968_s20 = smov (%p40_p0, %s38_s20), 0  ;;  %p61_p5 = scmp.eq.s32.totalorder %s1333_s18, 0 }
   0xf   : > { %p1692_p4 = por %p55_p2, %p54_p1  ;;  %s44_s23 = ssub.s32 %s1618_s16, %s1968_s20 }
  0x10   : > { %p112_p6 = scmp.eq.s32.totalorder %s1333_s18, 1  ;;  %p45_p7 = scmp.eq.s32.totalorder %s44_s23, 0 }
  0x11   : > { %p1698_p8 = por %p61_p5, %p60_p3  ;;  %p118_p10 = scmp.eq.s32.totalorder %s1334_s19, 1 }
  0x12   : > { %p1702_p9 = por %p112_p6, %p54_p1  ;;  %p1383_p13 = scmp.lt.s32.totalorder %s1622_s17, 2 }
  0x13   : > { %s1950_s24 = scalar_select %p1698_p8, 1, 0 }
  0x14   : > { %s1951_s25 = scalar_select %p1702_p9, 1, 0 }
  0x15   : > { %s1707_s26 = scalar_select %p45_p7, %s1610_s14, %s47_s21  }
  0x16   : > { %p1709_p11 = por %p118_p10, %p60_p3  ;;  %s1716_s28 = sand.u32 1, %s1610_s14  }
  0x17   : > { %s1337_s29 = sshll.u32 %s1716_s28, 2  ;;  %s1338_s30 = sshll.u32 %s1618_s16, 6 }
  0x18   : > { %s1952_s27 = scalar_select %p1709_p11, 1, 0 }
  0x19   : > { %s1723_s6 = scalar_lea.hbm %s1943_s0, %s1338_s30  ;;  %s168_s7 = scalar_lea.vmem [#allocation2], %s1337_s29 }
  0x1a   : > { %s176_s8 = sshll.u32 %s168_s7, 4  ;;  %p1729_p0 = pnand %p1383_p13, %p1692_p4  ;;  %s1725_s8 = int_to_ptr.vmem [resolvable:$true] %s176_s8 }
  0x1b   : > { %s165_s10 = scalar_lea.sflag [#allocation3], %s1716_s28  ;;  %s1444_s11 = scalar_lea.hbm %s1723_s6, 64 }
  0x1c   : > { %p1445_p3 = scmp.ne.s32.totalorder %s1723_s6, %s1444_s11  ;;  %p1446_p5 = pneg %p1729_p0 }
  0x1d   : > { %s1449_s21 = scalar_lea.hbm %s1943_s0, 128  ;;  %p1450_p4 = scmp.lt.u32.totalorder %s1723_s6, %s1943_s0 }
  0x1e   : > { %p1447_p6 = pnand %p1446_p5, %p1445_p3  ;;  %p1451_p10 = scmp.lt.u32.totalorder %s1449_s21, %s1444_s11 }
  0x1f   : > { %p1453_p12 = scmp.lt.u32.totalorder %s1444_s11, %s1723_s6 }
  0x20   : > { %p1448_p7 = pneg %p1447_p6  ;;  %p1452_p13 = por %p1451_p10, %p1450_p4 }
  0x22   : > { %p1454_p1 = por %p1453_p12, %p1452_p13 }
  0x24   : > { %p1455_p2 = pnand %p1454_p1, %p1448_p7 }
  0x26   : > { %1458 = shalt.err (!%p1455_p2)
}
  0x27   : > { %s1459_s29 = scalar_lea.vmem %s1725_s8, 64  ;;  %s1624_s30 = smov [#allocation2]  }
  0x28   : > { %p1460_p3 = scmp.ne.s32.totalorder %s1725_s8, %s1459_s29  ;;  %s1464_s4 = sshll.u32 %s1624_s30, 4  ;;  %s1465_s4 = int_to_ptr.vmem [resolvable:$false] %s1464_s4 }
  0x29   : > { %s1466_s5 = scalar_lea.vmem %s1465_s4, 128  ;;  %p1467_p9 = scmp.lt.s32.totalorder %s1725_s8, %s1465_s4 }
  0x2a   : > { %p1462_p6 = pnand %p1460_p3, %p1446_p5  ;;  %p1468_p4 = scmp.lt.s32.totalorder %s1466_s5, %s1459_s29 }
  0x2c   : > { %p1463_p11 = pneg %p1462_p6  ;;  %p1469_p10 = por %p1468_p4, %p1467_p9 }
  0x2e   : > { %p1470_p12 = pnand %p1469_p10, %p1463_p11 }
  0x30   : > { %1473 = shalt.err (!%p1470_p12)
}
  0x31   : > { %1372 = dma.hbm_to_vmem [thread:$0]  (!%p1729_p0), %s1723_s6, 64, %s1725_s8, %s165_s10  }
  0x32   : > { %p1954_p1 = scmp.lt.s32.totalorder %s1622_s17, 3  ;;  %p1955_p2 = scmp.ge.s32.totalorder %s1622_s17, 1 }
  0x33   : > { %s1339_s11 = sshll.u32 %s1716_s28, 6  ;;  %s1353_s18 = sshll.u32 %s1618_s16, 10 }
  0x34   : > { %p1765_p7 = pnand %p1955_p2, %p1954_p1  ;;  %s1774_s22 = scalar_lea.hbm %s1944_s1, %s1353_s18 }
  0x35   : > { %s187_s23 = scalar_lea.vmem [#allocation5], %s1339_s11  ;;  %s184_s6 = scalar_lea.sflag [#allocation6], %s1716_s28 }
  0x36   : > { %s1956_s7 = scalar_select %p1765_p7, 1, 0 }
  0x37   : > { %s196_s29 = sshll.u32 %s187_s23, 4  ;;  %s1474_s8 = scalar_lea.hbm %s1774_s22, 1024  ;;  %s197_s29 = int_to_ptr.vmem [resolvable:$true] %s196_s29 }
  0x38   : > { %p1475_p9 = scmp.ne.s32.totalorder %s1774_s22, %s1474_s8  ;;  %s1479_s4 = scalar_lea.hbm %s1944_s1, 2048 }
  0x39   : > { %p1480_p3 = scmp.lt.u32.totalorder %s1774_s22, %s1944_s1  ;;  %p1481_p6 = scmp.lt.u32.totalorder %s1479_s4, %s1474_s8 }
  0x3a   : > { %p1477_p11 = pnand %p1475_p9, %p1446_p5  ;;  %p1483_p10 = scmp.lt.u32.totalorder %s1474_s8, %s1774_s22 }
  0x3b   : > { %p1482_p4 = por %p1481_p6, %p1480_p3 }
  0x3c   : > { %p1478_p13 = pneg %p1477_p11 }
  0x3d   : > { %p1484_p12 = por %p1483_p10, %p1482_p4 }
  0x3f   : > { %p1485_p1 = pnand %p1484_p12, %p1478_p13 }
  0x41   : > { %1488 = shalt.err (!%p1485_p1)
}
  0x42   : > { %s1489_s28 = scalar_lea.vmem %s197_s29, 1024  ;;  %s1625_s11 = smov [#allocation5]  }
  0x43   : > { %p1490_p2 = scmp.ne.s32.totalorder %s197_s29, %s1489_s28  ;;  %s1494_s19 = sshll.u32 %s1625_s11, 4  ;;  %s1495_s19 = int_to_ptr.vmem [resolvable:$false] %s1494_s19 }
  0x44   : > { %s1496_s21 = scalar_lea.vmem %s1495_s19, 2048  ;;  %p1497_p8 = scmp.lt.s32.totalorder %s197_s29, %s1495_s19 }
  0x45   : > { %p1492_p9 = pnand %p1490_p2, %p1446_p5  ;;  %p1498_p7 = scmp.lt.s32.totalorder %s1496_s21, %s1489_s28 }
  0x47   : > { %p1493_p11 = pneg %p1492_p9  ;;  %p1499_p3 = por %p1498_p7, %p1497_p8 }
  0x49   : > { %p1500_p6 = pnand %p1499_p3, %p1493_p11 }
  0x4b   : > { %1503 = shalt.err (!%p1500_p6)
}
  0x4c   : > { %1375 = dma.hbm_to_vmem [thread:$0]  (!%p1729_p0), %s1774_s22, 1024, %s197_s29, %s184_s6  }
  0x4d   : > { %p1957_p13 = scmp.ne.s32.totalorder %s1956_s7, 0 }
  0x4e   : > { %s1799_s23 = sand.u32 (!%p1957_p13), 1, %s1606_s13   ;;  %p1958_p5 = scmp.ne.s32.totalorder (!%p1957_p13), %s1950_s24, 0 }
  0x4f   : > { %205 = sbr.rel (%p1957_p13) target bundleno = 397 (0x18d), region = 28  ;;  %s1343_s8 = sshll.u32 (!%p1957_p13), %s1799_s23, 2 }
  0x50   : > { %s208_s10 = scalar_lea.sflag (!%p1957_p13), [#allocation3], %s1799_s23  ;;  %s211_s30 = scalar_lea.vmem (!%p1957_p13), [#allocation2], %s1343_s8 }
  0x56   : > { %1585 = dma.done.wait (%p1958_p5), %s208_s10, 64  }
  0x57   : > { %1587 = vsyncadd (%p1958_p5), %s208_s10, 4294967232  ;;  %s1344_s9 = sshll.u32 %s1799_s23, 6  ;;  %s217_s7 = scalar_lea.sflag [#allocation6], %s1799_s23 }
  0x58   : > { %s1809_s22 = scalar_lea.vmem [#allocation5], %s1344_s9 }
  0x59   : > { %1589 = dma.done.wait (%p1958_p5), %s217_s7, 1024  }
  0x5a   : > { %1591 = vsyncadd (%p1958_p5), %s217_s7, 4294966272  ;;  %vm261_vm0 = vcmask 27648   ;;  %v360_v0 = vlaneseq  ;;  %s1815_s29 = scalar_lea.vmem [#allocation8], %s1343_s8  ;;  %v1626_v1 = vmov 0.0   ;;  %v1627_v2 = vmov 1983009808  }
  0x5b   : > { %263 = vst.msk [vmem:[%s1815_s29] sm:$0xf] %vm261_vm0, %v1626_v1  ;;  %1356 = vmatprep.subr.mxu0 %v1626_v1  ;;  %v358_v3 = vunpack.c.l.s4 %v1627_v2  ;;  %vm1628_vm1 = vmmov 0   ;;  %s1819_s6 = scalar_lea.vmem [#allocation7], %s1343_s8  ;;  %v264_v7 = vld [vmem:[%s211_s30] sm:$0xf] }
  0x5c   : > { %v361_v4 = vshrl.u32 %v360_v0, 7  ;;  %1358 = vmatprep.mubr.msk.f32.mxu0 %vm1628_vm1, %v1626_v1  ;;  %262 = vst.msk [vmem:[%s1819_s6] sm:$0xf] %vm261_vm0, %v1626_v1  ;;  %v265_v8 = vld [vmem:[%s1809_s22] sm:$0xff]  ;;  %v266_v9 = vld [vmem:[%s1809_s22 + $0x8] sm:$0xff]  ;;  %1357 = vmatpush3.xpose.msra.mxu0 %v264_v7  ;;  %v267_v14 = vld [vmem:[%s1809_s22 + $0x10] sm:$0xff] }
  0x5d   : > { %v359_v5 = vunpack.c.0.s8 %v358_v3  ;;  %v356_v10 = vcombine.high %v265_v8, %v265_v8  ;;  %v373_v13 = vcombine.high %v266_v9, %v266_v9  ;;  %v390_v21 = vcombine.high %v267_v14, %v267_v14  ;;  %v268_v24 = vld [vmem:[%s1809_s22 + $0x18] sm:$0xff]  ;;  %v269_v30 = vld [vmem:[%s1809_s22 + $0x20] sm:$0xff]  ;;  %v270_v36 = vld [vmem:[%s1809_s22 + $0x28] sm:$0xff]  ;;  %s1349_s24 = sshll.u32 %s1614_s15, 6  ;;  %s1185_s4 = sshll.u32 %s1819_s6, 4  ;;  %s1859_s4 = int_to_ptr.vmem [resolvable:$true] %s1185_s4 }
  0x5e   : > { %v407_v27 = vcombine.high %v268_v24, %v268_v24  ;;  %v424_v33 = vcombine.high %v269_v30, %v269_v30  ;;  %v441_v39 = vcombine.high %v270_v36, %v270_v36  ;;  %v271_v42 = vld [vmem:[%s1809_s22 + $0x30] sm:$0xff]  ;;  %v272_v48 = vld [vmem:[%s1809_s22 + $0x38] sm:$0xff]  ;;  %s1857_s28 = scalar_lea.hbm %s1945_s2, %s1349_s24  ;;  %s1167_s11 = scalar_lea.sflag [#allocation4], %s1799_s23 }
  0x5f   : > { %v1823_v6 = vsub.s32 %v359_v5, %v361_v4  ;;  %1359 = vmatmul.mubr.f32.vlgmr.msra.gmra.mrb[0].mxu0 %v264_v7  ;;  %v458_v45 = vcombine.high %v271_v42, %v271_v42  ;;  %v475_v51 = vcombine.high %v272_v48, %v272_v48  ;;  %s1504_s19 = scalar_lea.vmem %s1859_s4, 64  ;;  %p1959_p0 = scmp.ne.s32.totalorder %s1951_s25, 0 }
  0x60   : > { %p1505_p8 = scmp.ne.s32.totalorder %s1859_s4, %s1504_s19  ;;  %s1629_s21 = smov [#allocation7]  }
  0x61   : > { %v363_v11 = vrot.slane %v265_v8, %v1823_v6  ;;  %v380_v12 = vrot.slane %v266_v9, %v1823_v6  ;;  %v370_v16 = vrot.slane %v356_v10, %v1823_v6  ;;  %v387_v18 = vrot.slane %v373_v13, %v1823_v6  ;;  %s1508_s8 = sshll.u32 %s1629_s21, 4  ;;  %s1509_s8 = int_to_ptr.vmem [resolvable:$false] %s1508_s8 }
  0x62   : > { %v397_v22 = vrot.slane %v267_v14, %v1823_v6  ;;  %v404_v23 = vrot.slane %v390_v21, %v1823_v6  ;;  %v414_v28 = vrot.slane %v268_v24, %v1823_v6  ;;  %v421_v29 = vrot.slane %v407_v27, %v1823_v6  ;;  %p1506_p7 = pnand %p1505_p8, %p1959_p0  ;;  %s1510_s10 = scalar_lea.vmem %s1509_s8, 128 }
  0x63   : > { %v371_v15 = vcombine.high %v363_v11, %v363_v11  ;;  %v388_v17 = vcombine.high %v380_v12, %v380_v12  ;;  %v372_v19 = vcombine.high %v370_v16, %v370_v16  ;;  %v389_v20 = vcombine.high %v387_v18, %v387_v18  ;;  %v273_v56 = vld [vmem:[%s1819_s6] sm:$0xf]  ;;  %p1511_p10 = scmp.lt.s32.totalorder %s1859_s4, %s1509_s8  ;;  %p1512_p12 = scmp.lt.s32.totalorder %s1510_s10, %s1504_s19 }
  0x64   : > { %v405_v25 = vcombine.high %v397_v22, %v397_v22  ;;  %v406_v26 = vcombine.high %v404_v23, %v404_v23  ;;  %v422_v31 = vcombine.high %v414_v28, %v414_v28  ;;  %v423_v32 = vcombine.high %v421_v29, %v421_v29  ;;  %p1507_p4 = pneg %p1506_p7 }
  0x65   : > { %524 = vmatprep.subr.bf16.mxu1 %v371_v15  ;;  %556 = vmatprep.mubr.bf16.mxu1 %v371_v15  ;;  %v431_v34 = vrot.slane %v269_v30, %v1823_v6  ;;  %v438_v35 = vrot.slane %v424_v33, %v1823_v6  ;;  %v448_v40 = vrot.slane %v270_v36, %v1823_v6  ;;  %p1513_p1 = por %p1512_p12, %p1511_p10 }
  0x66   : > { %525 = vmatpush1.bf16.xpose.msra.mxu1 %v363_v11  ;;  %564 = vmatprep.subr.bf16.mxu0 %v372_v19  ;;  %v455_v41 = vrot.slane %v441_v39, %v1823_v6  ;;  %v465_v46 = vrot.slane %v271_v42, %v1823_v6  ;;  %v472_v47 = vrot.slane %v458_v45, %v1823_v6 }
  0x67   : > { %604 = vmatprep.subr.bf16.mxu1 %v388_v17  ;;  %565 = vmatpush1.bf16.xpose.msra.mxu0 %v370_v16  ;;  %v439_v37 = vcombine.high %v431_v34, %v431_v34  ;;  %v440_v38 = vcombine.high %v438_v35, %v438_v35  ;;  %v456_v43 = vcombine.high %v448_v40, %v448_v40  ;;  %p1514_p2 = pnand %p1513_p1, %p1507_p4 }
  0x68   : > { %596 = vmatprep.mubr.bf16.mxu0 %v372_v19  ;;  %644 = vmatprep.subr.bf16.mxu0 %v389_v20  ;;  %v457_v44 = vcombine.high %v455_v41, %v455_v41  ;;  %v473_v49 = vcombine.high %v465_v46, %v465_v46  ;;  %v474_v50 = vcombine.high %v472_v47, %v472_v47 }
  0x69   : > { %v482_v52 = vrot.slane %v272_v48, %v1823_v6  ;;  %v489_v53 = vrot.slane %v475_v51, %v1823_v6 }
  0x6b   : > { %v490_v54 = vcombine.high %v482_v52, %v482_v52  ;;  %v491_v55 = vcombine.high %v489_v53, %v489_v53 }
  0x6d   : > { %557 = vmatmul.mubr.bf16.vlgmr.msra.gmra.mrb[0].mxu1 %v363_v11 }
  0x6e   : > { %605 = vmatpush1.bf16.xpose.msra.mxu1 %v380_v12  ;;  %636 = vmatprep.mubr.bf16.mxu1 %v388_v17 }
  0x6f   : > { %597 = vmatmul.mubr.bf16.vlgmr.msra.gmra.mrb[4].mxu0 %v370_v16  ;;  %684 = vmatprep.subr.bf16.mxu1 %v405_v25 }
  0x70   : > { %645 = vmatpush1.bf16.xpose.msra.mxu0 %v387_v18  ;;  %676 = vmatprep.mubr.bf16.mxu0 %v389_v20 }
  0x71   : > { %724 = vmatprep.subr.bf16.mxu0 %v406_v26 }
  0x75   : > { %637 = vmatmul.mubr.bf16.vlgmr.msra.gmra.mrb[4].mxu1 %v380_v12 }
  0x76   : > { %685 = vmatpush1.bf16.xpose.msra.mxu1 %v397_v22  ;;  %716 = vmatprep.mubr.bf16.mxu1 %v405_v25 }
  0x77   : > { %677 = vmatmul.mubr.bf16.vlgmr.msra.gmra.mrb[8].mxu0 %v387_v18  ;;  %764 = vmatprep.subr.bf16.mxu1 %v422_v31 }
  0x78   : > { %725 = vmatpush1.bf16.xpose.msra.mxu0 %v404_v23  ;;  %756 = vmatprep.mubr.bf16.mxu0 %v406_v26 }
  0x79   : > { %804 = vmatprep.subr.bf16.mxu0 %v423_v32 }
  0x7d   : > { %717 = vmatmul.mubr.bf16.vlgmr.msra.gmra.mrb[8].mxu1 %v397_v22 }
  0x7e   : > { %765 = vmatpush1.bf16.xpose.msra.mxu1 %v414_v28  ;;  %796 = vmatprep.mubr.bf16.mxu1 %v422_v31 }
  0x7f   : > { %757 = vmatmul.mubr.bf16.vlgmr.msra.gmra.mrb[12].mxu0 %v404_v23  ;;  %844 = vmatprep.subr.bf16.mxu1 %v439_v37 }
  0x80   : > { %805 = vmatpush1.bf16.xpose.msra.mxu0 %v421_v29  ;;  %836 = vmatprep.mubr.bf16.mxu0 %v423_v32 }
  0x81   : > { %884 = vmatprep.subr.bf16.mxu0 %v440_v38 }
  0x85   : > { %797 = vmatmul.mubr.bf16.vlgmr.msra.gmra.mrb[12].mxu1 %v414_v28 }
  0x86   : > { %845 = vmatpush1.bf16.xpose.msra.mxu1 %v431_v34  ;;  %876 = vmatprep.mubr.bf16.mxu1 %v439_v37 }
  0x87   : > { %837 = vmatmul.mubr.bf16.vlgmr.msra.gmra.mrb[16].mxu0 %v421_v29  ;;  %924 = vmatprep.subr.bf16.mxu1 %v456_v43 }
  0x88   : > { %885 = vmatpush1.bf16.xpose.msra.mxu0 %v438_v35  ;;  %916 = vmatprep.mubr.bf16.mxu0 %v440_v38 }
  0x89   : > { %964 = vmatprep.subr.bf16.mxu0 %v457_v44 }
  0x8d   : > { %877 = vmatmul.mubr.bf16.vlgmr.msra.gmra.mrb[16].mxu1 %v431_v34 }
  0x8e   : > { %925 = vmatpush1.bf16.xpose.msra.mxu1 %v448_v40  ;;  %956 = vmatprep.mubr.bf16.mxu1 %v456_v43 }
  0x8f   : > { %917 = vmatmul.mubr.bf16.vlgmr.msra.gmra.mrb[20].mxu0 %v438_v35  ;;  %1004 = vmatprep.subr.bf16.mxu1 %v473_v49 }
  0x90   : > { %965 = vmatpush1.bf16.xpose.msra.mxu0 %v455_v41  ;;  %996 = vmatprep.mubr.bf16.mxu0 %v457_v44 }
  0x91   : > { %1044 = vmatprep.subr.bf16.mxu0 %v474_v50 }
  0x95   : > { %957 = vmatmul.mubr.bf16.vlgmr.msra.gmra.mrb[20].mxu1 %v448_v40 }
  0x96   : > { %1005 = vmatpush1.bf16.xpose.msra.mxu1 %v465_v46  ;;  %1036 = vmatprep.mubr.bf16.mxu1 %v473_v49 }
  0x97   : > { %997 = vmatmul.mubr.bf16.vlgmr.msra.gmra.mrb[24].mxu0 %v455_v41  ;;  %1084 = vmatprep.subr.bf16.mxu1 %v490_v54 }
  0x98   : > { %1045 = vmatpush1.bf16.xpose.msra.mxu0 %v472_v47  ;;  %1076 = vmatprep.mubr.bf16.mxu0 %v474_v50 }
  0x99   : > { %1124 = vmatprep.subr.bf16.mxu0 %v491_v55 }
  0x9d   : > { %1037 = vmatmul.mubr.bf16.vlgmr.msra.gmra.mrb[24].mxu1 %v465_v46 }
  0x9e   : > { %1085 = vmatpush1.bf16.xpose.msra.mxu1 %v482_v52  ;;  %1116 = vmatprep.mubr.bf16.mxu1 %v490_v54 }
  0x9f   : > { %1077 = vmatmul.mubr.bf16.vlgmr.msra.gmra.mrb[28].mxu0 %v472_v47 }
  0xa0   : > { %1125 = vmatpush1.bf16.xpose.msra.mxu0 %v489_v53  ;;  %1156 = vmatprep.mubr.bf16.mxu0 %v491_v55 }
  0xa5   : > { %1117 = vmatmul.mubr.bf16.vlgmr.msra.gmra.mrb[28].mxu1 %v482_v52 }
  0xa7   : > { %1157 = vmatmul.mubr.bf16.vlgmr.msra.gmra.mrb[32].mxu0 %v489_v53 }
 0x132   : > { %v340_v57 = vpop.f32.mrb[0].mxu0 }
 0x133   : > { %v344_v58 = vadd.f32 %v340_v57, %v273_v56  ;;  %v1360_v59 = vpop.f32.mrb[1].mxu0 }
 0x135   : > { %346 = vst.msk [vmem:[%s1819_s6] sm:$0xf] %vm261_vm0, %v344_v58 }
 0x136   : > { %1517 = shalt.err (!%p1514_p2)
}
 0x137   : > { %s1518_s30 = scalar_lea.hbm %s1857_s28, 64  ;;  %s1522_s22 = scalar_lea.hbm %s1945_s2, 128 }
 0x138   : > { %p1519_p9 = scmp.ne.s32.totalorder %s1857_s28, %s1518_s30  ;;  %p1523_p6 = scmp.lt.u32.totalorder %s1857_s28, %s1945_s2 }
 0x139   : > { %p1524_p13 = scmp.lt.u32.totalorder %s1522_s22, %s1518_s30  ;;  %p1526_p8 = scmp.lt.u32.totalorder %s1518_s30, %s1857_s28 }
 0x13a   : > { %p1520_p11 = pnand %p1519_p9, %p1959_p0 }
 0x13b   : > { %p1525_p5 = por %p1524_p13, %p1523_p6 }
 0x13c   : > { %p1521_p3 = pneg %p1520_p11 }
 0x13d   : > { %p1527_p7 = por %p1526_p8, %p1525_p5 }
 0x13f   : > { %p1528_p4 = pnand %p1527_p7, %p1521_p3 }
 0x141   : > { %1531 = shalt.err (!%p1528_p4)
}
 0x142   : > { %1365 = dma.vmem_to_hbm [thread:$0]  (%p1959_p0), %s1859_s4, 64, %s1857_s28, %s1167_s11   ;;  %v558_v60 = vpop.f32.mrb[0].mxu1  ;;  %v598_v63 = vpop.f32.mrb[4].mxu0 }
 0x143   : > { %v560_v61 = vpop.f32.mrb[1].mxu1  ;;  %v599_v0 = vadd.f32 %v598_v63, %v558_v60  ;;  %v600_v2 = vpop.f32.mrb[5].mxu0  ;;  %s1198_s4 = sshll.u32 %s1815_s29, 4  ;;  %s1892_s11 = scalar_lea.hbm %s1946_s3, %s1349_s24  ;;  %s1894_s4 = int_to_ptr.vmem [resolvable:$true] %s1198_s4 }
 0x144   : > { %v561_v62 = vpop.f32.mrb[2].mxu1  ;;  %v601_v3 = vpop.f32.mrb[6].mxu0  ;;  %s1172_s19 = scalar_lea.sflag [#allocation9], %s1799_s23  ;;  %s1532_s21 = scalar_lea.vmem %s1894_s4, 64 }
 0x145   : > { %v562_v1 = vpop.f32.mrb[3].mxu1  ;;  %v602_v4 = vpop.f32.mrb[7].mxu0  ;;  %p1533_p10 = scmp.ne.s32.totalorder %s1894_s4, %s1532_s21  ;;  %s1630_s8 = smov [#allocation8]  }
 0x146   : > { %s1536_s15 = sshll.u32 %s1630_s8, 4  ;;  %s1537_s15 = int_to_ptr.vmem [resolvable:$false] %s1536_s15 }
 0x147   : > { %p1534_p12 = pnand %p1533_p10, %p1959_p0  ;;  %s1538_s10 = scalar_lea.vmem %s1537_s15, 128 }
 0x148   : > { %v638_v5 = vpop.f32.mrb[4].mxu1  ;;  %p1539_p2 = scmp.lt.s32.totalorder %s1894_s4, %s1537_s15  ;;  %p1540_p9 = scmp.lt.s32.totalorder %s1538_s10, %s1532_s21 }
 0x149   : > { %v639_v6 = vadd.f32 %v638_v5, %v599_v0  ;;  %v640_v7 = vpop.f32.mrb[5].mxu1  ;;  %v347_v5 = vld [vmem:[%s1815_s29] sm:$0xf]  ;;  %p1535_p1 = pneg %p1534_p12 }
 0x14a   : > { %v641_v8 = vpop.f32.mrb[6].mxu1  ;;  %v678_v9 = vpop.f32.mrb[8].mxu0  ;;  %p1541_p11 = por %p1540_p9, %p1539_p2 }
 0x14b   : > { %v679_v10 = vadd.f32 %v678_v9, %v639_v6  ;;  %v642_v11 = vpop.f32.mrb[7].mxu1  ;;  %v680_v12 = vpop.f32.mrb[9].mxu0 }
 0x14c   : > { %v681_v13 = vpop.f32.mrb[10].mxu0  ;;  %p1542_p3 = pnand %p1541_p11, %p1535_p1 }
 0x14d   : > { %v682_v14 = vpop.f32.mrb[11].mxu0 }
 0x150   : > { %v718_v15 = vpop.f32.mrb[8].mxu1 }
 0x151   : > { %v719_v16 = vadd.f32 %v718_v15, %v679_v10  ;;  %v720_v17 = vpop.f32.mrb[9].mxu1 }
 0x152   : > { %v721_v18 = vpop.f32.mrb[10].mxu1  ;;  %v758_v19 = vpop.f32.mrb[12].mxu0 }
 0x153   : > { %v759_v20 = vadd.f32 %v758_v19, %v719_v16  ;;  %v722_v21 = vpop.f32.mrb[11].mxu1  ;;  %v760_v22 = vpop.f32.mrb[13].mxu0 }
 0x154   : > { %v761_v23 = vpop.f32.mrb[14].mxu0 }
 0x155   : > { %v762_v24 = vpop.f32.mrb[15].mxu0 }
 0x158   : > { %v798_v25 = vpop.f32.mrb[12].mxu1 }
 0x159   : > { %v799_v26 = vadd.f32 %v798_v25, %v759_v20  ;;  %v800_v27 = vpop.f32.mrb[13].mxu1 }
 0x15a   : > { %v801_v28 = vpop.f32.mrb[14].mxu1  ;;  %v838_v29 = vpop.f32.mrb[16].mxu0 }
 0x15b   : > { %v839_v30 = vadd.f32 %v838_v29, %v799_v26  ;;  %v802_v31 = vpop.f32.mrb[15].mxu1  ;;  %v840_v32 = vpop.f32.mrb[17].mxu0 }
 0x15c   : > { %v841_v33 = vpop.f32.mrb[18].mxu0 }
 0x15d   : > { %v842_v34 = vpop.f32.mrb[19].mxu0 }
 0x160   : > { %v878_v35 = vpop.f32.mrb[16].mxu1 }
 0x161   : > { %v879_v36 = vadd.f32 %v878_v35, %v839_v30  ;;  %v880_v37 = vpop.f32.mrb[17].mxu1 }
 0x162   : > { %v881_v38 = vpop.f32.mrb[18].mxu1  ;;  %v918_v39 = vpop.f32.mrb[20].mxu0 }
 0x163   : > { %v919_v40 = vadd.f32 %v918_v39, %v879_v36  ;;  %v882_v41 = vpop.f32.mrb[19].mxu1  ;;  %v920_v42 = vpop.f32.mrb[21].mxu0 }
 0x164   : > { %v921_v43 = vpop.f32.mrb[22].mxu0 }
 0x165   : > { %v922_v44 = vpop.f32.mrb[23].mxu0 }
 0x168   : > { %v958_v45 = vpop.f32.mrb[20].mxu1 }
 0x169   : > { %v959_v46 = vadd.f32 %v958_v45, %v919_v40  ;;  %v960_v47 = vpop.f32.mrb[21].mxu1 }
 0x16a   : > { %v961_v48 = vpop.f32.mrb[22].mxu1  ;;  %v998_v49 = vpop.f32.mrb[24].mxu0 }
 0x16b   : > { %v999_v50 = vadd.f32 %v998_v49, %v959_v46  ;;  %v962_v51 = vpop.f32.mrb[23].mxu1  ;;  %v1000_v52 = vpop.f32.mrb[25].mxu0 }
 0x16c   : > { %v1001_v53 = vpop.f32.mrb[26].mxu0 }
 0x16d   : > { %v1002_v54 = vpop.f32.mrb[27].mxu0 }
 0x170   : > { %v1038_v55 = vpop.f32.mrb[24].mxu1 }
 0x171   : > { %v1039_v56 = vadd.f32 %v1038_v55, %v999_v50  ;;  %v1040_v57 = vpop.f32.mrb[25].mxu1 }
 0x172   : > { %v1041_v58 = vpop.f32.mrb[26].mxu1  ;;  %v1078_v59 = vpop.f32.mrb[28].mxu0 }
 0x173   : > { %v1079_v60 = vadd.f32 %v1078_v59, %v1039_v56  ;;  %v1042_v61 = vpop.f32.mrb[27].mxu1  ;;  %v1080_v62 = vpop.f32.mrb[29].mxu0 }
 0x174   : > { %v1081_v63 = vpop.f32.mrb[30].mxu0 }
 0x175   : > { %v1082_v0 = vpop.f32.mrb[31].mxu0 }
 0x178   : > { %v1118_v1 = vpop.f32.mrb[28].mxu1 }
 0x179   : > { %v1119_v2 = vadd.f32 %v1118_v1, %v1079_v60  ;;  %v1120_v3 = vpop.f32.mrb[29].mxu1 }
 0x17a   : > { %v1121_v4 = vpop.f32.mrb[30].mxu1  ;;  %v1158_v6 = vpop.f32.mrb[32].mxu0 }
 0x17b   : > { %v1159_v7 = vadd.f32 %v1158_v6, %v1119_v2  ;;  %v1122_v8 = vpop.f32.mrb[31].mxu1  ;;  %v1160_v9 = vpop.f32.mrb[33].mxu0 }
 0x17c   : > { %v1161_v10 = vpop.f32.mrb[34].mxu0 }
 0x17d   : > { %v1164_v11 = vadd.f32 %v1159_v7, %v347_v5  ;;  %v1162_v12 = vpop.f32.mrb[35].mxu0 }
 0x17f   : > { %1165 = vst.msk [vmem:[%s1815_s29] sm:$0xf] %vm261_vm0, %v1164_v11 }
 0x180   : > { %1545 = shalt.err (!%p1542_p3)
}
 0x181   : > { %s1546_s23 = scalar_lea.hbm %s1892_s11, 64  ;;  %s1550_s30 = scalar_lea.hbm %s1946_s3, 128 }
 0x182   : > { %p1547_p6 = scmp.ne.s32.totalorder %s1892_s11, %s1546_s23  ;;  %p1551_p8 = scmp.lt.u32.totalorder %s1892_s11, %s1946_s3 }
 0x183   : > { %p1552_p7 = scmp.lt.u32.totalorder %s1550_s30, %s1546_s23  ;;  %p1554_p10 = scmp.lt.u32.totalorder %s1546_s23, %s1892_s11 }
 0x184   : > { %p1548_p13 = pnand %p1547_p6, %p1959_p0 }
 0x185   : > { %p1553_p4 = por %p1552_p7, %p1551_p8 }
 0x186   : > { %p1549_p5 = pneg %p1548_p13 }
 0x187   : > { %p1555_p12 = por %p1554_p10, %p1553_p4 }
 0x189   : > { %p1556_p1 = pnand %p1555_p12, %p1549_p5 }
 0x18b   : > { %1559 = shalt.err (!%p1556_p1)
}
 0x18c   : > { %1366 = dma.vmem_to_hbm [thread:$0]  (%p1959_p0), %s1894_s4, 64, %s1892_s11, %s1172_s19  }
 0x18d PF: > { %s1210_s22 = sand.u32 1, %s1602_s12   ;;  %p1960_p2 = scmp.ne.s32.totalorder %s1952_s27, 0 }
 0x18e   : > { %p1961_p9 = scmp.ge.s32.totalorder %s1622_s17, 2  ;;  %s1211_s6 = scalar_lea.sflag [#allocation4], %s1210_s22 }
 0x190   : > { %p1377_p11 = pnand %p1961_p9, %p1960_p2 }
 0x192   : > { %1593 = dma.done.wait (!%p1377_p11), %s1211_s6, 64  }
 0x193   : > { %1595 = vsyncadd (!%p1377_p11), %s1211_s6, 4294967232  ;;  %s1220_s5 = scalar_lea.sflag [#allocation9], %s1210_s22 }
 0x194   : > { %1597 = dma.done.wait (!%p1377_p11), %s1220_s5, 64  }
 0x195   : > { %1599 = vsyncadd (!%p1377_p11), %s1220_s5, 4294967232  ;;  %s26_s17 = sadd.s32 1, %s1622_s17   ;;  %s1962_s12 = smov %s1606_s13 }
 0x196   : > { %p23_p3 = scmp.ge.s32.totalorder %s26_s17, 4   ;;  %s1963_s13 = smov %s1610_s14 }
 0x197   : > { %s1964_s14 = smov %s1707_s26  ;;  %s1965_s15 = smov %s1618_s16 }
 0x198   : > { %s1966_s16 = smov %s1968_s20  ;;  %25 = sbr.rel (!%p23_p3) target bundleno = 10 (0xa), region = 107 }
 0x19f   :  { %1225 = vsyncpa [#allocation3], 1 }
 0x1a0   :  { %1227 = vsyncpa [#allocation3 + $0x1], 1 }
 0x1a1   :  { %1228 = vsyncpa [#allocation6], 1 }
 0x1a2   :  { %1230 = vsyncpa [#allocation6 + $0x1], 1 }
 0x1a3   :  { %1231 = vsyncpa [#allocation4], 1 }
 0x1a4   :  { %1233 = vsyncpa [#allocation4 + $0x1], 1 }
 0x1a5   :  { %1234 = vsyncpa [#allocation9], 1 }
 0x1a6   :  { %1236 = vsyncpa [#allocation9 + $0x1], 1 }

</bundles_post_ra>
